<compile_context>
chip_gen: v6e
topology: v6e:2x2x1
jax: 0.10.0
libtpu: 0.0.40
codegen_flags: <defaults>
</compile_context>

<pallas_src>
import math
import functools

import jax
import jax.numpy as jnp
import numpy as np
from jax import lax
from jax.experimental import pallas as pl
from jax.experimental.pallas import tpu as pltpu

LN_EPS = 1e-5
_INV_SQRT2 = np.float32(1.0 / math.sqrt(2.0))


def _layernorm(v, g, b):
    mu = jnp.mean(v, axis=-1, keepdims=True)
    var = jnp.mean((v - mu) ** 2, axis=-1, keepdims=True)
    return (v - mu) * lax.rsqrt(var + LN_EPS) * g + b


def _gelu_exact(x):
    # torch.nn.functional.gelu default = exact erf formulation
    return 0.5 * x * (1.0 + lax.erf(x * _INV_SQRT2))


def block_kernel(x_ref,
                 g1_ref, b1_ref,
                 wqkv_ref, wo_ref, bo_ref,
                 g2_ref, b2_ref,
                 w1_ref, bb1_ref, w2_ref, bb2_ref,
                 o_ref, *, n_heads):
    N, D = x_ref.shape                 # one batch element per grid step (batch squeezed)
    hd = D // n_heads
    cd = wqkv_ref.dtype                # matmul operand dtype (f32 or bf16); accum is f32

    x = x_ref[...]

    # ---- pre-attention LayerNorm (f32 VPU math) ----
    n1 = _layernorm(x, g1_ref[...], b1_ref[...])

    # ---- fused QKV projection: ONE (N, D) @ (D, 3D) MXU matmul ----
    # 1/sqrt(hd) is pre-folded into the Q weight columns in the wrapper.
    qkv = jnp.dot(n1.astype(cd), wqkv_ref[...], preferred_element_type=jnp.float32)
    qkv_c = qkv.astype(cd)             # single cast shared by all q/k/v head slices

    # ---- attention: static per-head lane slices; logits/softmax in f32 ----
    head_outs = []
    for h in range(n_heads):
        qh = qkv_c[:, h * hd:(h + 1) * hd]                       # (N, hd)
        kh = qkv_c[:, D + h * hd:D + (h + 1) * hd]               # (N, hd)
        vh = qkv_c[:, 2 * D + h * hd:2 * D + (h + 1) * hd]       # (N, hd)
        # q @ k^T without materializing a transpose (contract last dims).
        s = lax.dot_general(qh, kh, (((1,), (1,)), ((), ())),
                            preferred_element_type=jnp.float32)  # (N, N)
        s = s - jnp.max(s, axis=-1, keepdims=True)
        e = jnp.exp(s)
        inv = pl.reciprocal(jnp.sum(e, axis=-1, keepdims=True), approx=True)
        p = (e * inv).astype(cd)                                 # one cast, logit-sized
        head_outs.append(jnp.dot(p, vh, preferred_element_type=jnp.float32))

    # ---- output projection: ONE (N, D) @ (D, D) matmul on concatenated heads ----
    o_cat = jnp.concatenate(head_outs, axis=-1)                  # (N, D)
    attn = jnp.dot(o_cat.astype(cd), wo_ref[...],
                   preferred_element_type=jnp.float32) + bo_ref[...]
    x1 = x + attn

    # ---- pre-FFN LayerNorm + MLP (Linear -> exact GELU -> Linear) ----
    n2 = _layernorm(x1, g2_ref[...], b2_ref[...])
    h1 = jnp.dot(n2.astype(cd), w1_ref[...],
                 preferred_element_type=jnp.float32) + bb1_ref[...]
    h1 = _gelu_exact(h1)
    ffn = jnp.dot(h1.astype(cd), w2_ref[...],
                  preferred_element_type=jnp.float32) + bb2_ref[...]

    o_ref[...] = x1 + ffn


def self_attention_block(x, params, n_heads, compute_dtype=jnp.float32):
    """x: (B, N, D) float32. compute_dtype controls MXU operand dtype (f32 or bf16)."""
    B, N, D = x.shape
    hd = D // n_heads
    hidden = params["w1"].shape[0]
    f32 = jnp.float32
    q_scale = f32(1.0 / math.sqrt(hd))

    # torch Linear weight is (out, in); kernel computes x @ W^T -> store W^T.
    wqkv = jnp.concatenate(
        [params["wq"].T * q_scale, params["wk"].T, params["wv"].T],
        axis=-1).astype(compute_dtype)                              # (D, 3D)

    args = (
        params["ln1_g"].reshape(1, D).astype(f32),
        params["ln1_b"].reshape(1, D).astype(f32),
        wqkv,
        params["wo"].T.astype(compute_dtype),                       # (D, D)
        params["bo"].reshape(1, D).astype(f32),
        params["ln2_g"].reshape(1, D).astype(f32),
        params["ln2_b"].reshape(1, D).astype(f32),
        params["w1"].T.astype(compute_dtype),                       # (D, hidden)
        params["b1"].reshape(1, hidden).astype(f32),
        params["w2"].T.astype(compute_dtype),                       # (hidden, D)
        params["b2"].reshape(1, D).astype(f32),
    )

    def pinned(a):  # weights: constant block index -> fetched once, never re-DMAed
        return pl.BlockSpec(a.shape, lambda b: (0, 0))

    in_specs = ([pl.BlockSpec((None, N, D), lambda b: (b, 0, 0))]   # stream x per batch
                + [pinned(a) for a in args])

    kernel = functools.partial(block_kernel, n_heads=n_heads)
    return pl.pallas_call(
        kernel,
        out_shape=jax.ShapeDtypeStruct((B, N, D), jnp.float32),
        grid_spec=pltpu.PrefetchScalarGridSpec(
            num_scalar_prefetch=0,
            grid=(B,),                                              # batch grid
            in_specs=in_specs,
            out_specs=pl.BlockSpec((None, N, D), lambda b: (b, 0, 0)),
        ),
        compiler_params=pltpu.CompilerParams(
            dimension_semantics=("parallel",)),                     # megacore on v7x
    )(x, *args)


def reference_block(x, params, n_heads):
    """Pure-JAX reference (mirrors PyTorch forward in eval mode)."""
    B, N, D = x.shape
    hd = D // n_heads

    def ln(v, g, b):
        mu = v.mean(-1, keepdims=True)
        var = ((v - mu) ** 2).mean(-1, keepdims=True)
        return (v - mu) / jnp.sqrt(var + LN_EPS) * g + b

    n1 = ln(x, params["ln1_g"], params["ln1_b"])
    q = n1 @ params["wq"].T
    k = n1 @ params["wk"].T
    v = n1 @ params["wv"].T
    q = q.reshape(B, N, n_heads, hd).transpose(0, 2, 1, 3)
    k = k.reshape(B, N, n_heads, hd).transpose(0, 2, 1, 3)
    v = v.reshape(B, N, n_heads, hd).transpose(0, 2, 1, 3)
    s = jnp.einsum("bhqd,bhkd->bhqk", q, k) / math.sqrt(hd)
    p = jax.nn.softmax(s, axis=-1)
    o = jnp.einsum("bhqk,bhkd->bhqd", p, v).transpose(0, 2, 1, 3).reshape(B, N, D)
    o = o @ params["wo"].T + params["bo"]
    x1 = x + o
    n2 = ln(x1, params["ln2_g"], params["ln2_b"])
    h = jax.nn.gelu(n2 @ params["w1"].T + params["b1"], approximate=False)
    f = h @ params["w2"].T + params["b2"]
    return x1 + f


if __name__ == "__main__":
    B, N, D = 2, 16, 32
    n_heads = 4
    hidden = 4 * D  # ffn_expansion_factor=4

    key = jax.random.PRNGKey(0)
    ks = jax.random.split(key, 12)
    scale = 0.05
    params = {
        "ln1_g": jnp.ones((D,), jnp.float32),
        "ln1_b": jnp.zeros((D,), jnp.float32),
        "wq": scale * jax.random.normal(ks[0], (D, D), jnp.float32),
        "wk": scale * jax.random.normal(ks[1], (D, D), jnp.float32),
        "wv": scale * jax.random.normal(ks[2], (D, D), jnp.float32),
        "wo": scale * jax.random.normal(ks[3], (D, D), jnp.float32),
        "bo": scale * jax.random.normal(ks[4], (D,), jnp.float32),
        "ln2_g": jnp.ones((D,), jnp.float32),
        "ln2_b": jnp.zeros((D,), jnp.float32),
        "w1": scale * jax.random.normal(ks[5], (hidden, D), jnp.float32),
        "b1": scale * jax.random.normal(ks[6], (hidden,), jnp.float32),
        "w2": scale * jax.random.normal(ks[7], (D, hidden), jnp.float32),
        "b2": scale * jax.random.normal(ks[8], (D,), jnp.float32),
    }
    x = jax.random.normal(ks[9], (B, N, D), jnp.float32)

    ref = reference_block(x, params, n_heads)

    # f32 matmul operands (approx reciprocal in softmax -> slightly looser than exact).
    out = jax.block_until_ready(self_attention_block(x, params, n_heads))
    np.testing.assert_allclose(np.asarray(out), np.asarray(ref), atol=1e-3, rtol=1e-3)

    # bf16 matmul operands (f32 accumulation): MXU-friendly path on v5e/v6e/v7x.
    out_bf16 = jax.block_until_ready(
        self_attention_block(x, params, n_heads, compute_dtype=jnp.bfloat16))
    np.testing.assert_allclose(np.asarray(out_bf16), np.asarray(ref), atol=2e-2, rtol=2e-2)

    print("KERNEL_OK")
</pallas_src>

<mosaic_0001>
module attributes {stable_mosaic.version = 11 : i64} {
  func.func @block_kernel(%arg0: i32, %arg1: memref<1x16x32xf32, #tpu.memory_space<vmem>>, %arg2: memref<1x32xf32, #tpu.memory_space<vmem>>, %arg3: memref<1x32xf32, #tpu.memory_space<vmem>>, %arg4: memref<32x96xf32, #tpu.memory_space<vmem>>, %arg5: memref<32x32xf32, #tpu.memory_space<vmem>>, %arg6: memref<1x32xf32, #tpu.memory_space<vmem>>, %arg7: memref<1x32xf32, #tpu.memory_space<vmem>>, %arg8: memref<1x32xf32, #tpu.memory_space<vmem>>, %arg9: memref<32x128xf32, #tpu.memory_space<vmem>>, %arg10: memref<1x128xf32, #tpu.memory_space<vmem>>, %arg11: memref<128x32xf32, #tpu.memory_space<vmem>>, %arg12: memref<1x32xf32, #tpu.memory_space<vmem>>, %arg13: memref<1x16x32xf32, #tpu.memory_space<vmem>>) attributes {dimension_semantics = [#tpu.dimension_semantics<parallel>], iteration_bounds = array<i64: 2>, scalar_prefetch = 0 : i64, scratch_operands = 0 : i64, tpu.core_type = #tpu.core_type<tc>, window_params = [{transform_indices = @transform_0, window_bounds = array<i64: 1, 16, 32>}, {pipeline_mode = #tpu.pipeline_mode<synchronous>, transform_indices = @transform_1, window_bounds = array<i64: 1, 32>}, {pipeline_mode = #tpu.pipeline_mode<synchronous>, transform_indices = @transform_2, window_bounds = array<i64: 1, 32>}, {pipeline_mode = #tpu.pipeline_mode<synchronous>, transform_indices = @transform_3, window_bounds = array<i64: 32, 96>}, {pipeline_mode = #tpu.pipeline_mode<synchronous>, transform_indices = @transform_4, window_bounds = array<i64: 32, 32>}, {pipeline_mode = #tpu.pipeline_mode<synchronous>, transform_indices = @transform_5, window_bounds = array<i64: 1, 32>}, {pipeline_mode = #tpu.pipeline_mode<synchronous>, transform_indices = @transform_6, window_bounds = array<i64: 1, 32>}, {pipeline_mode = #tpu.pipeline_mode<synchronous>, transform_indices = @transform_7, window_bounds = array<i64: 1, 32>}, {pipeline_mode = #tpu.pipeline_mode<synchronous>, transform_indices = @transform_8, window_bounds = array<i64: 32, 128>}, {pipeline_mode = #tpu.pipeline_mode<synchronous>, transform_indices = @transform_9, window_bounds = array<i64: 1, 128>}, {pipeline_mode = #tpu.pipeline_mode<synchronous>, transform_indices = @transform_10, window_bounds = array<i64: 128, 32>}, {pipeline_mode = #tpu.pipeline_mode<synchronous>, transform_indices = @transform_11, window_bounds = array<i64: 1, 32>}, {transform_indices = @transform_12, window_bounds = array<i64: 1, 16, 32>}]} {
    %c0 = arith.constant 0 : index
    %c0_0 = arith.constant 0 : index
    %c0_1 = arith.constant 0 : index
    %0 = vector.load %arg1[%c0, %c0_0, %c0_1] : memref<1x16x32xf32, #tpu.memory_space<vmem>>, vector<1x16x32xf32>
    %1 = vector.shape_cast %0 : vector<1x16x32xf32> to vector<16x32xf32>
    %c0_2 = arith.constant 0 : index
    %c0_3 = arith.constant 0 : index
    %2 = vector.load %arg2[%c0_2, %c0_3] : memref<1x32xf32, #tpu.memory_space<vmem>>, vector<1x32xf32>
    %c0_4 = arith.constant 0 : index
    %c0_5 = arith.constant 0 : index
    %3 = vector.load %arg3[%c0_4, %c0_5] : memref<1x32xf32, #tpu.memory_space<vmem>>, vector<1x32xf32>
    %cst = arith.constant dense<0.000000e+00> : vector<16xf32>
    %4 = vector.multi_reduction <add>, %1, %cst [1] : vector<16x32xf32> to vector<16xf32>
    %5 = vector.shape_cast %4 : vector<16xf32> to vector<16x1xf32>
    %cst_6 = arith.constant 3.200000e+01 : f32
    %6 = vector.broadcast %cst_6 : f32 to vector<16x1xf32>
    %7 = arith.divf %5, %6 : vector<16x1xf32>
    %8 = vector.broadcast %7 : vector<16x1xf32> to vector<16x32xf32>
    %9 = arith.subf %1, %8 : vector<16x32xf32>
    %10 = arith.mulf %9, %9 : vector<16x32xf32>
    %cst_7 = arith.constant dense<0.000000e+00> : vector<16xf32>
    %11 = vector.multi_reduction <add>, %10, %cst_7 [1] : vector<16x32xf32> to vector<16xf32>
    %12 = vector.shape_cast %11 : vector<16xf32> to vector<16x1xf32>
    %cst_8 = arith.constant 3.200000e+01 : f32
    %13 = vector.broadcast %cst_8 : f32 to vector<16x1xf32>
    %14 = arith.divf %12, %13 : vector<16x1xf32>
    %15 = vector.broadcast %7 : vector<16x1xf32> to vector<16x32xf32>
    %16 = arith.subf %1, %15 : vector<16x32xf32>
    %cst_9 = arith.constant 9.99999974E-6 : f32
    %17 = vector.broadcast %cst_9 : f32 to vector<16x1xf32>
    %18 = arith.addf %14, %17 : vector<16x1xf32>
    %19 = math.rsqrt %18 : vector<16x1xf32>
    %20 = vector.broadcast %19 : vector<16x1xf32> to vector<16x32xf32>
    %21 = arith.mulf %16, %20 : vector<16x32xf32>
    %22 = vector.broadcast %2 : vector<1x32xf32> to vector<16x32xf32>
    %23 = arith.mulf %21, %22 : vector<16x32xf32>
    %24 = vector.broadcast %3 : vector<1x32xf32> to vector<16x32xf32>
    %25 = arith.addf %23, %24 : vector<16x32xf32>
    %c0_10 = arith.constant 0 : index
    %c0_11 = arith.constant 0 : index
    %26 = vector.load %arg4[%c0_10, %c0_11] : memref<32x96xf32, #tpu.memory_space<vmem>>, vector<32x96xf32>
    %cst_12 = arith.constant dense<0.000000e+00> : vector<16x96xf32>
    %27 = tpu.matmul %25, %26, %cst_12 {dimension_numbers = #tpu.dot_dimension_numbers<[1], [0], [0], [1], [0, 0, 1, 1], [], []>} : vector<16x32xf32>, vector<32x96xf32>, vector<16x96xf32> -> vector<16x96xf32>
    %28 = vector.extract_strided_slice %27 {offsets = [0, 0], sizes = [16, 8], strides = [1, 1]} : vector<16x96xf32> to vector<16x8xf32>
    %29 = vector.extract_strided_slice %27 {offsets = [0, 32], sizes = [16, 8], strides = [1, 1]} : vector<16x96xf32> to vector<16x8xf32>
    %30 = vector.extract_strided_slice %27 {offsets = [0, 64], sizes = [16, 8], strides = [1, 1]} : vector<16x96xf32> to vector<16x8xf32>
    %cst_13 = arith.constant dense<0.000000e+00> : vector<16x16xf32>
    %31 = tpu.matmul %28, %29, %cst_13 {dimension_numbers = #tpu.dot_dimension_numbers<[1], [1], [0], [0], [0, 0, 1, 0], [], []>} : vector<16x8xf32>, vector<16x8xf32>, vector<16x16xf32> -> vector<16x16xf32>
    %cst_14 = arith.constant dense<0xFF800000> : vector<16xf32>
    %32 = vector.multi_reduction <maximumf>, %31, %cst_14 [1] : vector<16x16xf32> to vector<16xf32>
    %33 = vector.shape_cast %32 : vector<16xf32> to vector<16x1xf32>
    %34 = vector.broadcast %33 : vector<16x1xf32> to vector<16x16xf32>
    %35 = arith.subf %31, %34 : vector<16x16xf32>
    %36 = math.exp %35 : vector<16x16xf32>
    %cst_15 = arith.constant dense<0.000000e+00> : vector<16xf32>
    %37 = vector.multi_reduction <add>, %36, %cst_15 [1] : vector<16x16xf32> to vector<16xf32>
    %38 = vector.shape_cast %37 : vector<16xf32> to vector<16x1xf32>
    %39 = tpu.reciprocal %38 {approx = true} : vector<16x1xf32> -> vector<16x1xf32>
    %40 = vector.broadcast %39 : vector<16x1xf32> to vector<16x16xf32>
    %41 = arith.mulf %36, %40 : vector<16x16xf32>
    %cst_16 = arith.constant dense<0.000000e+00> : vector<16x8xf32>
    %42 = tpu.matmul %41, %30, %cst_16 {dimension_numbers = #tpu.dot_dimension_numbers<[1], [0], [0], [1], [0, 0, 1, 1], [], []>} : vector<16x16xf32>, vector<16x8xf32>, vector<16x8xf32> -> vector<16x8xf32>
    %43 = vector.extract_strided_slice %27 {offsets = [0, 8], sizes = [16, 8], strides = [1, 1]} : vector<16x96xf32> to vector<16x8xf32>
    %44 = vector.extract_strided_slice %27 {offsets = [0, 40], sizes = [16, 8], strides = [1, 1]} : vector<16x96xf32> to vector<16x8xf32>
    %45 = vector.extract_strided_slice %27 {offsets = [0, 72], sizes = [16, 8], strides = [1, 1]} : vector<16x96xf32> to vector<16x8xf32>
    %cst_17 = arith.constant dense<0.000000e+00> : vector<16x16xf32>
    %46 = tpu.matmul %43, %44, %cst_17 {dimension_numbers = #tpu.dot_dimension_numbers<[1], [1], [0], [0], [0, 0, 1, 0], [], []>} : vector<16x8xf32>, vector<16x8xf32>, vector<16x16xf32> -> vector<16x16xf32>
    %cst_18 = arith.constant dense<0xFF800000> : vector<16xf32>
    %47 = vector.multi_reduction <maximumf>, %46, %cst_18 [1] : vector<16x16xf32> to vector<16xf32>
    %48 = vector.shape_cast %47 : vector<16xf32> to vector<16x1xf32>
    %49 = vector.broadcast %48 : vector<16x1xf32> to vector<16x16xf32>
    %50 = arith.subf %46, %49 : vector<16x16xf32>
    %51 = math.exp %50 : vector<16x16xf32>
    %cst_19 = arith.constant dense<0.000000e+00> : vector<16xf32>
    %52 = vector.multi_reduction <add>, %51, %cst_19 [1] : vector<16x16xf32> to vector<16xf32>
    %53 = vector.shape_cast %52 : vector<16xf32> to vector<16x1xf32>
    %54 = tpu.reciprocal %53 {approx = true} : vector<16x1xf32> -> vector<16x1xf32>
    %55 = vector.broadcast %54 : vector<16x1xf32> to vector<16x16xf32>
    %56 = arith.mulf %51, %55 : vector<16x16xf32>
    %cst_20 = arith.constant dense<0.000000e+00> : vector<16x8xf32>
    %57 = tpu.matmul %56, %45, %cst_20 {dimension_numbers = #tpu.dot_dimension_numbers<[1], [0], [0], [1], [0, 0, 1, 1], [], []>} : vector<16x16xf32>, vector<16x8xf32>, vector<16x8xf32> -> vector<16x8xf32>
    %58 = vector.extract_strided_slice %27 {offsets = [0, 16], sizes = [16, 8], strides = [1, 1]} : vector<16x96xf32> to vector<16x8xf32>
    %59 = vector.extract_strided_slice %27 {offsets = [0, 48], sizes = [16, 8], strides = [1, 1]} : vector<16x96xf32> to vector<16x8xf32>
    %60 = vector.extract_strided_slice %27 {offsets = [0, 80], sizes = [16, 8], strides = [1, 1]} : vector<16x96xf32> to vector<16x8xf32>
    %cst_21 = arith.constant dense<0.000000e+00> : vector<16x16xf32>
    %61 = tpu.matmul %58, %59, %cst_21 {dimension_numbers = #tpu.dot_dimension_numbers<[1], [1], [0], [0], [0, 0, 1, 0], [], []>} : vector<16x8xf32>, vector<16x8xf32>, vector<16x16xf32> -> vector<16x16xf32>
    %cst_22 = arith.constant dense<0xFF800000> : vector<16xf32>
    %62 = vector.multi_reduction <maximumf>, %61, %cst_22 [1] : vector<16x16xf32> to vector<16xf32>
    %63 = vector.shape_cast %62 : vector<16xf32> to vector<16x1xf32>
    %64 = vector.broadcast %63 : vector<16x1xf32> to vector<16x16xf32>
    %65 = arith.subf %61, %64 : vector<16x16xf32>
    %66 = math.exp %65 : vector<16x16xf32>
    %cst_23 = arith.constant dense<0.000000e+00> : vector<16xf32>
    %67 = vector.multi_reduction <add>, %66, %cst_23 [1] : vector<16x16xf32> to vector<16xf32>
    %68 = vector.shape_cast %67 : vector<16xf32> to vector<16x1xf32>
    %69 = tpu.reciprocal %68 {approx = true} : vector<16x1xf32> -> vector<16x1xf32>
    %70 = vector.broadcast %69 : vector<16x1xf32> to vector<16x16xf32>
    %71 = arith.mulf %66, %70 : vector<16x16xf32>
    %cst_24 = arith.constant dense<0.000000e+00> : vector<16x8xf32>
    %72 = tpu.matmul %71, %60, %cst_24 {dimension_numbers = #tpu.dot_dimension_numbers<[1], [0], [0], [1], [0, 0, 1, 1], [], []>} : vector<16x16xf32>, vector<16x8xf32>, vector<16x8xf32> -> vector<16x8xf32>
    %73 = vector.extract_strided_slice %27 {offsets = [0, 24], sizes = [16, 8], strides = [1, 1]} : vector<16x96xf32> to vector<16x8xf32>
    %74 = vector.extract_strided_slice %27 {offsets = [0, 56], sizes = [16, 8], strides = [1, 1]} : vector<16x96xf32> to vector<16x8xf32>
    %75 = vector.extract_strided_slice %27 {offsets = [0, 88], sizes = [16, 8], strides = [1, 1]} : vector<16x96xf32> to vector<16x8xf32>
    %cst_25 = arith.constant dense<0.000000e+00> : vector<16x16xf32>
    %76 = tpu.matmul %73, %74, %cst_25 {dimension_numbers = #tpu.dot_dimension_numbers<[1], [1], [0], [0], [0, 0, 1, 0], [], []>} : vector<16x8xf32>, vector<16x8xf32>, vector<16x16xf32> -> vector<16x16xf32>
    %cst_26 = arith.constant dense<0xFF800000> : vector<16xf32>
    %77 = vector.multi_reduction <maximumf>, %76, %cst_26 [1] : vector<16x16xf32> to vector<16xf32>
    %78 = vector.shape_cast %77 : vector<16xf32> to vector<16x1xf32>
    %79 = vector.broadcast %78 : vector<16x1xf32> to vector<16x16xf32>
    %80 = arith.subf %76, %79 : vector<16x16xf32>
    %81 = math.exp %80 : vector<16x16xf32>
    %cst_27 = arith.constant dense<0.000000e+00> : vector<16xf32>
    %82 = vector.multi_reduction <add>, %81, %cst_27 [1] : vector<16x16xf32> to vector<16xf32>
    %83 = vector.shape_cast %82 : vector<16xf32> to vector<16x1xf32>
    %84 = tpu.reciprocal %83 {approx = true} : vector<16x1xf32> -> vector<16x1xf32>
    %85 = vector.broadcast %84 : vector<16x1xf32> to vector<16x16xf32>
    %86 = arith.mulf %81, %85 : vector<16x16xf32>
    %cst_28 = arith.constant dense<0.000000e+00> : vector<16x8xf32>
    %87 = tpu.matmul %86, %75, %cst_28 {dimension_numbers = #tpu.dot_dimension_numbers<[1], [0], [0], [1], [0, 0, 1, 1], [], []>} : vector<16x16xf32>, vector<16x8xf32>, vector<16x8xf32> -> vector<16x8xf32>
    %88 = tpu.concatenate %42, %57, %72, %87 in 1 : vector<16x8xf32>, vector<16x8xf32>, vector<16x8xf32>, vector<16x8xf32> -> vector<16x32xf32>
    %c0_29 = arith.constant 0 : index
    %c0_30 = arith.constant 0 : index
    %89 = vector.load %arg5[%c0_29, %c0_30] : memref<32x32xf32, #tpu.memory_space<vmem>>, vector<32x32xf32>
    %cst_31 = arith.constant dense<0.000000e+00> : vector<16x32xf32>
    %90 = tpu.matmul %88, %89, %cst_31 {dimension_numbers = #tpu.dot_dimension_numbers<[1], [0], [0], [1], [0, 0, 1, 1], [], []>} : vector<16x32xf32>, vector<32x32xf32>, vector<16x32xf32> -> vector<16x32xf32>
    %c0_32 = arith.constant 0 : index
    %c0_33 = arith.constant 0 : index
    %91 = vector.load %arg6[%c0_32, %c0_33] : memref<1x32xf32, #tpu.memory_space<vmem>>, vector<1x32xf32>
    %92 = vector.broadcast %91 : vector<1x32xf32> to vector<16x32xf32>
    %93 = arith.addf %90, %92 : vector<16x32xf32>
    %94 = arith.addf %1, %93 : vector<16x32xf32>
    %c0_34 = arith.constant 0 : index
    %c0_35 = arith.constant 0 : index
    %95 = vector.load %arg7[%c0_34, %c0_35] : memref<1x32xf32, #tpu.memory_space<vmem>>, vector<1x32xf32>
    %c0_36 = arith.constant 0 : index
    %c0_37 = arith.constant 0 : index
    %96 = vector.load %arg8[%c0_36, %c0_37] : memref<1x32xf32, #tpu.memory_space<vmem>>, vector<1x32xf32>
    %cst_38 = arith.constant dense<0.000000e+00> : vector<16xf32>
    %97 = vector.multi_reduction <add>, %94, %cst_38 [1] : vector<16x32xf32> to vector<16xf32>
    %98 = vector.shape_cast %97 : vector<16xf32> to vector<16x1xf32>
    %cst_39 = arith.constant 3.200000e+01 : f32
    %99 = vector.broadcast %cst_39 : f32 to vector<16x1xf32>
    %100 = arith.divf %98, %99 : vector<16x1xf32>
    %101 = vector.broadcast %100 : vector<16x1xf32> to vector<16x32xf32>
    %102 = arith.subf %94, %101 : vector<16x32xf32>
    %103 = arith.mulf %102, %102 : vector<16x32xf32>
    %cst_40 = arith.constant dense<0.000000e+00> : vector<16xf32>
    %104 = vector.multi_reduction <add>, %103, %cst_40 [1] : vector<16x32xf32> to vector<16xf32>
    %105 = vector.shape_cast %104 : vector<16xf32> to vector<16x1xf32>
    %cst_41 = arith.constant 3.200000e+01 : f32
    %106 = vector.broadcast %cst_41 : f32 to vector<16x1xf32>
    %107 = arith.divf %105, %106 : vector<16x1xf32>
    %108 = vector.broadcast %100 : vector<16x1xf32> to vector<16x32xf32>
    %109 = arith.subf %94, %108 : vector<16x32xf32>
    %cst_42 = arith.constant 9.99999974E-6 : f32
    %110 = vector.broadcast %cst_42 : f32 to vector<16x1xf32>
    %111 = arith.addf %107, %110 : vector<16x1xf32>
    %112 = math.rsqrt %111 : vector<16x1xf32>
    %113 = vector.broadcast %112 : vector<16x1xf32> to vector<16x32xf32>
    %114 = arith.mulf %109, %113 : vector<16x32xf32>
    %115 = vector.broadcast %95 : vector<1x32xf32> to vector<16x32xf32>
    %116 = arith.mulf %114, %115 : vector<16x32xf32>
    %117 = vector.broadcast %96 : vector<1x32xf32> to vector<16x32xf32>
    %118 = arith.addf %116, %117 : vector<16x32xf32>
    %c0_43 = arith.constant 0 : index
    %c0_44 = arith.constant 0 : index
    %119 = vector.load %arg9[%c0_43, %c0_44] : memref<32x128xf32, #tpu.memory_space<vmem>>, vector<32x128xf32>
    %cst_45 = arith.constant dense<0.000000e+00> : vector<16x128xf32>
    %120 = tpu.matmul %118, %119, %cst_45 {dimension_numbers = #tpu.dot_dimension_numbers<[1], [0], [0], [1], [0, 0, 1, 1], [], []>} : vector<16x32xf32>, vector<32x128xf32>, vector<16x128xf32> -> vector<16x128xf32>
    %c0_46 = arith.constant 0 : index
    %c0_47 = arith.constant 0 : index
    %121 = vector.load %arg10[%c0_46, %c0_47] : memref<1x128xf32, #tpu.memory_space<vmem>>, vector<1x128xf32>
    %122 = vector.broadcast %121 : vector<1x128xf32> to vector<16x128xf32>
    %123 = arith.addf %120, %122 : vector<16x128xf32>
    %cst_48 = arith.constant 5.000000e-01 : f32
    %124 = vector.broadcast %cst_48 : f32 to vector<16x128xf32>
    %125 = arith.mulf %124, %123 : vector<16x128xf32>
    %cst_49 = arith.constant 0.707106769 : f32
    %126 = vector.broadcast %cst_49 : f32 to vector<16x128xf32>
    %127 = arith.mulf %123, %126 : vector<16x128xf32>
    %128 = math.erf %127 : vector<16x128xf32>
    %cst_50 = arith.constant 1.000000e+00 : f32
    %129 = vector.broadcast %cst_50 : f32 to vector<16x128xf32>
    %130 = arith.addf %129, %128 : vector<16x128xf32>
    %131 = arith.mulf %125, %130 : vector<16x128xf32>
    %c0_51 = arith.constant 0 : index
    %c0_52 = arith.constant 0 : index
    %132 = vector.load %arg11[%c0_51, %c0_52] : memref<128x32xf32, #tpu.memory_space<vmem>>, vector<128x32xf32>
    %cst_53 = arith.constant dense<0.000000e+00> : vector<16x32xf32>
    %133 = tpu.matmul %131, %132, %cst_53 {dimension_numbers = #tpu.dot_dimension_numbers<[1], [0], [0], [1], [0, 0, 1, 1], [], []>} : vector<16x128xf32>, vector<128x32xf32>, vector<16x32xf32> -> vector<16x32xf32>
    %c0_54 = arith.constant 0 : index
    %c0_55 = arith.constant 0 : index
    %134 = vector.load %arg12[%c0_54, %c0_55] : memref<1x32xf32, #tpu.memory_space<vmem>>, vector<1x32xf32>
    %135 = vector.broadcast %134 : vector<1x32xf32> to vector<16x32xf32>
    %136 = arith.addf %133, %135 : vector<16x32xf32>
    %137 = arith.addf %94, %136 : vector<16x32xf32>
    %c0_56 = arith.constant 0 : index
    %c0_57 = arith.constant 0 : index
    %c0_58 = arith.constant 0 : index
    %138 = vector.load %arg13[%c0_56, %c0_57, %c0_58] : memref<1x16x32xf32, #tpu.memory_space<vmem>>, vector<1x16x32xf32>
    %139 = vector.shape_cast %138 : vector<1x16x32xf32> to vector<16x32xf32>
    %140 = vector.shape_cast %137 : vector<16x32xf32> to vector<1x16x32xf32>
    tpu.vector_store %arg13[%c0_56, %c0_57, %c0_58], %140 {strides = array<i32>} : memref<1x16x32xf32, #tpu.memory_space<vmem>>, vector<1x16x32xf32>,
    return
  }
  func.func @transform_0(%arg0: i32) -> (i32, i32, i32) {
    %c0_i32 = arith.constant 0 : i32
    %c0_i32_0 = arith.constant 0 : i32
    %c0_i32_1 = arith.constant 0 : i32
    return %arg0, %c0_i32, %c0_i32_0 : i32, i32, i32
  }
  func.func @transform_1(%arg0: i32) -> (i32, i32) {
    %c0_i32 = arith.constant 0 : i32
    %c0_i32_0 = arith.constant 0 : i32
    %c0_i32_1 = arith.constant 0 : i32
    return %c0_i32, %c0_i32_0 : i32, i32
  }
  func.func @transform_2(%arg0: i32) -> (i32, i32) {
    %c0_i32 = arith.constant 0 : i32
    %c0_i32_0 = arith.constant 0 : i32
    %c0_i32_1 = arith.constant 0 : i32
    return %c0_i32, %c0_i32_0 : i32, i32
  }
  func.func @transform_3(%arg0: i32) -> (i32, i32) {
    %c0_i32 = arith.constant 0 : i32
    %c0_i32_0 = arith.constant 0 : i32
    %c0_i32_1 = arith.constant 0 : i32
    return %c0_i32, %c0_i32_0 : i32, i32
  }
  func.func @transform_4(%arg0: i32) -> (i32, i32) {
    %c0_i32 = arith.constant 0 : i32
    %c0_i32_0 = arith.constant 0 : i32
    %c0_i32_1 = arith.constant 0 : i32
    return %c0_i32, %c0_i32_0 : i32, i32
  }
  func.func @transform_5(%arg0: i32) -> (i32, i32) {
    %c0_i32 = arith.constant 0 : i32
    %c0_i32_0 = arith.constant 0 : i32
    %c0_i32_1 = arith.constant 0 : i32
    return %c0_i32, %c0_i32_0 : i32, i32
  }
  func.func @transform_6(%arg0: i32) -> (i32, i32) {
    %c0_i32 = arith.constant 0 : i32
    %c0_i32_0 = arith.constant 0 : i32
    %c0_i32_1 = arith.constant 0 : i32
    return %c0_i32, %c0_i32_0 : i32, i32
  }
  func.func @transform_7(%arg0: i32) -> (i32, i32) {
    %c0_i32 = arith.constant 0 : i32
    %c0_i32_0 = arith.constant 0 : i32
    %c0_i32_1 = arith.constant 0 : i32
    return %c0_i32, %c0_i32_0 : i32, i32
  }
  func.func @transform_8(%arg0: i32) -> (i32, i32) {
    %c0_i32 = arith.constant 0 : i32
    %c0_i32_0 = arith.constant 0 : i32
    %c0_i32_1 = arith.constant 0 : i32
    return %c0_i32, %c0_i32_0 : i32, i32
  }
  func.func @transform_9(%arg0: i32) -> (i32, i32) {
    %c0_i32 = arith.constant 0 : i32
    %c0_i32_0 = arith.constant 0 : i32
    %c0_i32_1 = arith.constant 0 : i32
    return %c0_i32, %c0_i32_0 : i32, i32
  }
  func.func @transform_10(%arg0: i32) -> (i32, i32) {
    %c0_i32 = arith.constant 0 : i32
    %c0_i32_0 = arith.constant 0 : i32
    %c0_i32_1 = arith.constant 0 : i32
    return %c0_i32, %c0_i32_0 : i32, i32
  }
  func.func @transform_11(%arg0: i32) -> (i32, i32) {
    %c0_i32 = arith.constant 0 : i32
    %c0_i32_0 = arith.constant 0 : i32
    %c0_i32_1 = arith.constant 0 : i32
    return %c0_i32, %c0_i32_0 : i32, i32
  }
  func.func @transform_12(%arg0: i32) -> (i32, i32, i32) {
    %c0_i32 = arith.constant 0 : i32
    %c0_i32_0 = arith.constant 0 : i32
    %c0_i32_1 = arith.constant 0 : i32
    return %arg0, %c0_i32, %c0_i32_0 : i32, i32, i32
  }
}

</mosaic_0001>

<bundles_post_ra>
// kernel: tpu_custom_call.1
= control target key start
LH: loop header
LB: loop body
LE: loop exit
PB: predicated region body
PF: predicated region fallthrough
CT: control target
= control target key end

     0   :  { %s2626_s0 = inlined_call_operand.vmem [shape: f32[2,16,32], index: 0, kind: input, shape index: {}]   ;;  %s2627_s1 = inlined_call_operand.vmem [shape: f32[1,32], index: 1, kind: input, shape index: {}]   ;;  %s2628_s2 = inlined_call_operand.vmem [shape: f32[1,32], index: 2, kind: input, shape index: {}]   ;;  %s2629_s3 = inlined_call_operand.vmem [shape: f32[32,96], index: 3, kind: input, shape index: {}]   ;;  %s2630_s4 = inlined_call_operand.vmem [shape: f32[32,32], index: 4, kind: input, shape index: {}]   ;;  %s2631_s5 = inlined_call_operand.vmem [shape: f32[1,32], index: 5, kind: input, shape index: {}]   ;;  %s2632_s6 = inlined_call_operand.vmem [shape: f32[1,32], index: 6, kind: input, shape index: {}]   ;;  %s2633_s7 = inlined_call_operand.vmem [shape: f32[1,32], index: 7, kind: input, shape index: {}]   ;;  %s2634_s8 = inlined_call_operand.vmem [shape: f32[32,128], index: 8, kind: input, shape index: {}]   ;;  %s2635_s9 = inlined_call_operand.vmem [shape: f32[1,128], index: 9, kind: input, shape index: {}]   ;;  %s2636_s10 = inlined_call_operand.vmem [shape: f32[128,32], index: 10, kind: input, shape index: {}]   ;;  %s2637_s11 = inlined_call_operand.vmem [shape: f32[1,32], index: 11, kind: input, shape index: {}]   ;;  %s2638_s12 = inlined_call_operand.hbm [shape: f32[2,16,32], index: 12, kind: output, shape index: {}]  }
   0x1   :  { %2640 = sst [smem:[#allocation5_spill]] %s2626_s0 }
   0x2   :  { %2641 = sst [smem:[#allocation6_spill]] %s2627_s1 }
   0x3   :  { %17 = vsyncpa [#allocation3], 0 }
   0x4   :  { %19 = vsyncpa [#allocation3 + $0x1], 0  ;;  %s2278_s21 = smov 0   ;;  %s2280_s22 = smov 0  }
   0x5   :  { %s2282_s23 = smov 0   ;;  %s2284_s24 = smov 0  }
   0x6 LB: > { %s2299_s25 = sadd.s32 4294967295, %s2195_s24   ;;  %s1794_s26 = sadd.s32 4294967294, %s2195_s24   ;;  %s2195_s24 = sphi %s2284_s24, %s2650_s24   ;;  %s2191_s23 = sphi %s2282_s23, %s2649_s23   ;;  %s2187_s22 = sphi %s2280_s22, %s2648_s22   ;;  %s2183_s21 = sphi %s2278_s21, %s2647_s21  }
   0x7   : > { %s2303_s27 = sadd.s32 1, %s2195_s24   ;;  %s289_s28 = sadd.s32 1, %s2191_s23 }
   0x8   : > { %s286_s29 = ssub.s32 %s2195_s24, %s2303_s27  ;;  %p299_p0 = scmp.ne.s32.totalorder %s2191_s23, %s2187_s22 }
   0x9   : > { %p287_p1 = scmp.eq.s32.totalorder %s286_s29, 0  ;;  %p300_p2 = scmp.eq.s32.totalorder %s2299_s25, 1 }
   0xa   : > { %p305_p3 = scmp.ne.s32.totalorder %s2187_s22, %s2183_s21  ;;  %p306_p4 = scmp.eq.s32.totalorder %s1794_s26, 1 }
   0xb   : > { %s2314_s30 = scalar_select %p287_p1, %s2191_s23, %s289_s28  }
   0xc   : > { %p2316_p5 = por %p300_p2, %p299_p0  ;;  %p2320_p6 = por %p306_p4, %p305_p3 }
   0xd   : > { %p1797_p7 = scmp.ge.s32.totalorder %s2195_s24, 1  ;;  %p365_p8 = scmp.lt.s32.totalorder %s2195_s24, 3 }
   0xf   : > { %p366_p9 = pnand %p1797_p7, %p365_p8 }
  0x10   : > { %p407_p10 = scmp.lt.s32.totalorder (!%p366_p9), %s2299_s25, 1  ;;  %s2644_s0 = sld [smem:[#allocation5_spill]] (!%p366_p9) }
  0x11   : > { %369 = sbr.rel (%p366_p9) target bundleno = 2951 (0xb87), region = 68  ;;  %s2645_s1 = sld [smem:[#allocation6_spill]] (!%p366_p9) }
  0x12   : > { %s2197_s29 = smov (!%p366_p9), 96   ;;  %s2200_s17 = smov (!%p366_p9), 112  }
  0x13   : > { %s2201_s18 = smov (!%p366_p9), 80   ;;  %s2203_s20 = smov (!%p366_p9), 72  }
  0x14   : > { %s2204_s26 = smov (!%p366_p9), 104   ;;  %s2205_s28 = smov (!%p366_p9), 64  }
  0x16   : > { %s408_s15 = scalar_select %p407_p10, %s2299_s25, 1  ;;  %vm416_vm0 = vcmask 261120   ;;  %v463_v14 = vld [vmem:[%s2629_s3 + $0x18] sm:$0xff]  ;;  %v462_v15 = vld [vmem:[%s2629_s3 + $0x10] sm:$0xff]  ;;  %v461_v16 = vld [vmem:[%s2629_s3 + $0x8] sm:$0xff]  ;;  %vm551_vm1 = vcmask 64512  }
  0x17   : > { %1913 = vmatprep.subr.mxu1 %v463_v14  ;;  %v460_v17 = vld [vmem:[%s2629_s3] sm:$0xff]  ;;  %vm635_vm2 = vcmask 130048   ;;  %vm1373_vm3 = vcmask 195584  }
  0x18   : > { %s1843_s16 = sshll.u32 %s408_s15, 4  ;;  %1914 = vmatpush3.msra.mxu1 %v463_v14  ;;  %v1801_v25 = vld [vmem:[%s2645_s1] ss:$0 sm:$0xff]  ;;  %s2198_s15 = smov 120  }
  0x19   : > { %s411_s19 = scalar_lea.vmem %s2644_s0, %s1843_s16  ;;  %1915 = vmatprep.subr.mxu1 %v462_v15  ;;  %v1802_v27 = vld [vmem:[%s2628_s2] ss:$0 sm:$0xff]  ;;  %s2199_s16 = smov 88  }
  0x1a   : > { %v2331_v0 = vld [vmem:[%s411_s19] sm:$0xff]  ;;  %v2333_v1 = vld [vmem:[%s411_s19 + $0x8] sm:$0xff]  ;;  %1916 = vmatpush3.msra.mxu1 %v462_v15  ;;  %s2202_s19 = smov 48  }
  0x1b   : > { %v417_v2 = vsel %vm416_vm0, %v2331_v0, 0.0  ;;  %v420_v3 = vsel %vm416_vm0, %v2333_v1, 0.0  ;;  %1917 = vmatprep.subr.mxu1 %v461_v16 }
  0x1c   : > { %418 = vadd.xlane.f32.xlu0 %v417_v2  ;;  %1918 = vmatpush3.msra.mxu1 %v461_v16 }
  0x1d   : > { %1919 = vmatprep.subr.mxu1 %v460_v17 }
  0x1e   : > { %1920 = vmatpush3.msra.mxu1 %v460_v17 }
  0x20   : > { %421 = vadd.xlane.f32.xlu0 %v420_v3 }
  0xa5   : > { %v419_v4 = vpop.xlane.xlu0 %418 }
  0xa6   : > { %v424_v5 = vmul.f32 0.03125, %v419_v4 }
  0xa8   : > { %v426_v6 = vsub.f32 %v2331_v0, %v424_v5 }
  0xa9   : > { %v422_v7 = vpop.xlane.xlu0 %421 }
  0xaa   : > { %v425_v8 = vmul.f32 0.03125, %v422_v7  ;;  %v428_v9 = vmul.f32 %v426_v6, %v426_v6 }
  0xac   : > { %v427_v10 = vsub.f32 %v2333_v1, %v425_v8  ;;  %v430_v11 = vsel %vm416_vm0, %v428_v9, 0.0 }
  0xad   : > { %431 = vadd.xlane.f32.xlu1 %v430_v11 }
  0xae   : > { %v429_v12 = vmul.f32 %v427_v10, %v427_v10 }
  0xb0   : > { %v433_v13 = vsel %vm416_vm0, %v429_v12, 0.0 }
  0xb1   : > { %434 = vadd.xlane.f32.xlu1 %v433_v13 }
 0x136   : > { %v432_v18 = vpop.xlane.xlu1 %431 }
 0x137   : > { %v436_v19 = vmul.f32 0.03125, %v432_v18 }
 0x139   : > { %v438_v20 = vadd.f32 1e-05, %v436_v19 }
 0x13a   : > { %v435_v21 = vpop.xlane.xlu1 %434 }
 0x13b   : > { %2091 = vrsqrt.f32 %v438_v20  ;;  %v437_v22 = vmul.f32 0.03125, %v435_v21 }
 0x13d   : > { %v439_v23 = vadd.f32 1e-05, %v437_v22 }
 0x13f   : > { %2093 = vrsqrt.f32 %v439_v23 }
 0x148   : > { %v2092_v24 = vpop.eup %2091 }
 0x149   : > { %v442_v26 = vmul.f32 %v2092_v24, %v426_v6 }
 0x14b   : > { %v450_v28 = vmul.f32 %v1801_v25, %v442_v26 }
 0x14c   : > { %v2094_v29 = vpop.eup %2093 }
 0x14d   : > { %v443_v30 = vmul.f32 %v2094_v29, %v427_v10  ;;  %v458_v31 = vadd.f32 %v1802_v27, %v450_v28 }
 0x14f   : > { %v451_v32 = vmul.f32 %v1801_v25, %v443_v30  ;;  %1921 = vmatprep.mubr.msk.f32.mxu1 %vm416_vm0, %v458_v31 }
 0x151   : > { %v459_v33 = vadd.f32 %v1802_v27, %v451_v32 }
 0x153   : > { %1922 = vmatmul.mubr.msk.f32.vlgmr.msra.gmra.mxu1 %vm416_vm0, %v459_v33 }
 0x213   : > { %v2363_v34 = vpop.f32.mrf.mxu1 }
 0x214   : > { %549 = vrot.lane.b32.xlu0 %v2363_v34, %s2197_s29 }
 0x215   : > { %v2366_v35 = vpop.f32.mrf.mxu1 }
 0x216   : > { %547 = vrot.lane.b32.xlu1 %v2366_v35, %s2197_s29  ;;  %1928 = vmatprep.mubr.msk.f32.mxu1 %vm551_vm1, %v2366_v35  ;;  %s2206_s29 = smov 56  }
 0x218   : > { %745 = vrot.lane.b32.xlu0 %v2366_v35, %s2198_s15 }
 0x21a   : > { %751 = vrot.lane.b32.xlu1 %v2363_v34, %s2199_s16 }
 0x21c   : > { %747 = vrot.lane.b32.xlu0 %v2363_v34, %s2198_s15  ;;  %s2207_s15 = smov 40  }
 0x21e   : > { %749 = vrot.lane.b32.xlu1 %v2366_v35, %s2199_s16  ;;  %s2639_s16 = smov 8  }
 0x220   : > { %945 = vrot.lane.b32.xlu0 %v2366_v35, %s2200_s17 }
 0x222   : > { %951 = vrot.lane.b32.xlu1 %v2363_v34, %s2201_s18 }
 0x226   : > { %949 = vrot.lane.b32.xlu1 %v2366_v35, %s2201_s18  ;;  %s2210_s18 = smov 24  }
 0x22a   : > { %947 = vrot.lane.b32.xlu1 %v2363_v34, %s2200_s17  ;;  %s2209_s17 = smov 16  }
 0x286   : > { %v550_v36 = vpop.permute.xlu0 %549 }
 0x287   : > { %1924 = vmatprep.subr.msk.mxu1 %vm551_vm1, %v550_v36 }
 0x288   : > { %1925 = vmatpush3.xpose.msk.msra.mxu1 %vm551_vm1, %v550_v36  ;;  %v548_v37 = vpop.permute.xlu1 %547 }
 0x289   : > { %1926 = vmatprep.subr.msk.mxu1 %vm551_vm1, %v548_v37 }
 0x28a   : > { %v746_v38 = vpop.permute.xlu0 %745 }
 0x28c   : > { %1927 = vmatpush3.xpose.msk.msra.mxu1 %vm551_vm1, %v548_v37  ;;  %v752_v39 = vpop.permute.xlu1 %751 }
 0x28d   : > { %1938 = vmatprep.subr.msk.mxu1 %vm551_vm1, %v752_v39 }
 0x28e   : > { %v748_v41 = vpop.permute.xlu0 %747 }
 0x28f   : > { %1929 = vmatmul.mubr.msk.f32.vlgmr.msra.gmra.mxu1 %vm551_vm1, %v2363_v34 }
 0x290   : > { %v750_v40 = vpop.permute.xlu1 %749  ;;  %1939 = vmatpush3.xpose.msk.msra.mxu1 %vm551_vm1, %v752_v39  ;;  %1942 = vmatprep.mubr.msk.f32.mxu1 %vm551_vm1, %v746_v38 }
 0x291   : > { %1940 = vmatprep.subr.msk.mxu1 %vm551_vm1, %v750_v40 }
 0x292   : > { %v946_v43 = vpop.permute.xlu0 %945 }
 0x294   : > { %v952_v42 = vpop.permute.xlu1 %951  ;;  %1941 = vmatpush3.xpose.msk.msra.mxu1 %vm551_vm1, %v750_v40 }
 0x295   : > { %1952 = vmatprep.subr.msk.mxu1 %vm551_vm1, %v952_v42 }
 0x297   : > { %1943 = vmatmul.mubr.msk.f32.vlgmr.msra.gmra.mxu1 %vm551_vm1, %v748_v41 }
 0x298   : > { %v950_v44 = vpop.permute.xlu1 %949  ;;  %1953 = vmatpush3.xpose.msk.msra.mxu1 %vm551_vm1, %v952_v42  ;;  %1956 = vmatprep.mubr.msk.f32.mxu1 %vm551_vm1, %v946_v43 }
 0x299   : > { %1954 = vmatprep.subr.msk.mxu1 %vm551_vm1, %v950_v44 }
 0x29c   : > { %1955 = vmatpush3.xpose.msk.msra.mxu1 %vm551_vm1, %v950_v44  ;;  %v948_v45 = vpop.permute.xlu1 %947 }
 0x29f   : > { %1957 = vmatmul.mubr.msk.f32.vlgmr.msra.gmra.mxu1 %vm551_vm1, %v948_v45 }
 0x34f   : > { %v2397_v46 = vpop.f32.mrf.mxu1 }
 0x350   : > { %v639_v54 = vsel %vm635_vm2, %v2397_v46, -inf }
 0x351   : > { %v2399_v47 = vpop.f32.mrf.mxu1 }
 0x352   : > { %v636_v3 = vsel %vm635_vm2, %v2399_v47, -inf }
 0x357   : > { %v2401_v48 = vpop.f32.mrf.mxu1 }
 0x358   : > { %v839_v5 = vsel %vm635_vm2, %v2401_v48, -inf }
 0x359   : > { %v2403_v49 = vpop.f32.mrf.mxu1 }
 0x35a   : > { %v836_v4 = vsel %vm635_vm2, %v2403_v49, -inf }
 0x35f   : > { %v1958_v50 = vpop.f32.mrf.mxu1 }
 0x360   : > { %v1039_v51 = vsel %vm635_vm2, %v1958_v50, -inf }
 0x361   : > { %1040 = vmax.xlane.f32.xlu1 %v1039_v51  ;;  %v1027_v52 = vpop.f32.mrf.mxu1 }
 0x362   : > { %v1036_v53 = vsel %vm635_vm2, %v1027_v52, -inf }
 0x363   : > { %1037 = vmax.xlane.f32.xlu0 %v1036_v53 }
 0x372   : > { %1058 = vrot.lane.b32.xlu1 %v2366_v35, %s2202_s19 }
 0x376   : > { %1151 = vrot.lane.b32.xlu1 %v2363_v34, %s2203_s20 }
 0x37a   : > { %1149 = vrot.lane.b32.xlu1 %v2366_v35, %s2203_s20 }
 0x37e   : > { %1147 = vrot.lane.b32.xlu1 %v2363_v34, %s2204_s26 }
 0x3a2   : > { %640 = vmax.xlane.f32.xlu1 %v639_v54 }
 0x3ea   : > { %v1041_v55 = vpop.xlane.xlu1 %1040 }
 0x3eb   : > { %v1043_v56 = vsub.f32 %v1958_v50, %v1041_v55 }
 0x3ec   : > { %v1038_v57 = vpop.xlane.xlu0 %1037 }
 0x3ed   : > { %v1046_v58 = vmul.f32 1.442695, %v1043_v56  ;;  %v1042_v59 = vsub.f32 %v1027_v52, %v1038_v57 }
 0x3ee   : > { %v1059_v8 = vpop.permute.xlu1 %1058 }
 0x3ef   : > { %2095 = vpow2.f32 %v1046_v58  ;;  %v1044_v60 = vmul.f32 1.442695, %v1042_v59 }
 0x3f1   : > { %2097 = vpow2.f32 %v1044_v60 }
 0x3f2   : > { %v1152_v10 = vpop.permute.xlu1 %1151 }
 0x3f6   : > { %v1150_v16 = vpop.permute.xlu1 %1149 }
 0x3fa   : > { %v1148_v17 = vpop.permute.xlu1 %1147 }
 0x3fc   : > { %v2096_v61 = vpop.eup %2095 }
 0x3fd   : > { %v1051_v62 = vsel %vm635_vm2, %v2096_v61, 0.0 }
 0x3fe   : > { %v2098_v63 = vpop.eup %2097  ;;  %1052 = vadd.xlane.f32.xlu0 %v1051_v62 }
 0x3ff   : > { %v1048_v2 = vsel %vm635_vm2, %v2098_v63, 0.0 }
 0x402   : > { %1049 = vadd.xlane.f32.xlu0 %v1048_v2 }
 0x418   : > { %1060 = vrot.lane.b32.xlu0 %v2363_v34, %s2202_s19  ;;  %s404_s19 = sand.u32 1, %s2187_s22  }
 0x419   : > { %s1798_s20 = sshll.u32 %s404_s19, 4 }
 0x41c   : > { %1145 = vrot.lane.b32.xlu0 %v2366_v35, %s2204_s26 }
 0x42b   : > { %v641_v20 = vpop.xlane.xlu1 %640 }
 0x42c   : > { %v643_v21 = vsub.f32 %v2397_v46, %v641_v20  ;;  %v1379_v20 = vld [vmem:[%s2630_s4 + $0x18] sm:$0xff] }
 0x42e   : > { %v646_v24 = vmul.f32 1.442695, %v643_v21  ;;  %v1378_v21 = vld [vmem:[%s2630_s4 + $0x10] sm:$0xff] }
 0x43b   : > { %637 = vmax.xlane.f32.xlu0 %v636_v3 }
 0x43f   : > { %837 = vmax.xlane.f32.xlu0 %v836_v4 }
 0x443   : > { %840 = vmax.xlane.f32.xlu0 %v839_v5 }
 0x487   : > { %v1053_v6 = vpop.xlane.xlu0 %1052 }
 0x488   : > { %2099 = vrcp.f32 %v1053_v6 }
 0x48b   : > { %v1050_v7 = vpop.xlane.xlu0 %1049 }
 0x48c   : > { %2101 = vrcp.f32 %v1050_v7 }
 0x48d   : > { %2103 = vpow2.f32 %v646_v24 }
 0x48f   : > { %v1061_v9 = vpop.permute.xlu0 %1060 }
 0x490   : > { %1959 = vmatprep.subr.mxu1 %v1061_v9 }
 0x491   : > { %1960 = vmatpush3.msra.mxu1 %v1061_v9 }
 0x492   : > { %1961 = vmatprep.subr.mxu1 %v1059_v8 }
 0x493   : > { %1962 = vmatpush3.msra.mxu1 %v1059_v8  ;;  %v1146_v15 = vpop.permute.xlu0 %1145 }
 0x494   : > { %1966 = vmatprep.subr.msk.mxu1 %vm551_vm1, %v1152_v10 }
 0x495   : > { %v2100_v11 = vpop.eup %2099 }
 0x496   : > { %v1057_v14 = vmul.f32 %v2100_v11, %v2096_v61 }
 0x499   : > { %v2102_v12 = vpop.eup %2101 }
 0x49a   : > { %v1056_v13 = vmul.f32 %v2102_v12, %v2098_v63  ;;  %v2104_v36 = vpop.eup %2103 }
 0x49b   : > { %v651_v40 = vsel %vm635_vm2, %v2104_v36, 0.0 }
 0x49c   : > { %1963 = vmatprep.mubr.msk.f32.mxu1 %vm635_vm2, %v1056_v13 }
 0x49d   : > { %1964 = vmatmul.mubr.msk.f32.vlgmr.msra.gmra.mxu1 %vm635_vm2, %v1057_v14 }
 0x49e   : > { %1967 = vmatpush3.xpose.msk.msra.mxu1 %vm551_vm1, %v1152_v10  ;;  %1970 = vmatprep.mubr.msk.f32.mxu1 %vm551_vm1, %v1146_v15 }
 0x49f   : > { %1968 = vmatprep.subr.msk.mxu1 %vm551_vm1, %v1150_v16 }
 0x4a2   : > { %1969 = vmatpush3.xpose.msk.msra.mxu1 %vm551_vm1, %v1150_v16 }
 0x4a5   : > { %1971 = vmatmul.mubr.msk.f32.vlgmr.msra.gmra.mxu1 %vm551_vm1, %v1148_v17 }
 0x4c4   : > { %v638_v18 = vpop.xlane.xlu0 %637 }
 0x4c5   : > { %v642_v23 = vsub.f32 %v2399_v47, %v638_v18 }
 0x4c7   : > { %v644_v26 = vmul.f32 1.442695, %v642_v23  ;;  %v1376_v23 = vld [vmem:[%s2630_s4] sm:$0xff] }
 0x4c8   : > { %v838_v19 = vpop.xlane.xlu0 %837 }
 0x4c9   : > { %v842_v27 = vsub.f32 %v2403_v49, %v838_v19  ;;  %2105 = vpow2.f32 %v644_v26 }
 0x4cb   : > { %v844_v29 = vmul.f32 1.442695, %v842_v27 }
 0x4cc   : > { %v841_v22 = vpop.xlane.xlu0 %840 }
 0x4cd   : > { %v843_v25 = vsub.f32 %v2401_v48, %v841_v22  ;;  %v1377_v22 = vld [vmem:[%s2630_s4 + $0x8] sm:$0xff] }
 0x4cf   : > { %v846_v28 = vmul.f32 1.442695, %v843_v25 }
 0x4d1   : > { %2107 = vpow2.f32 %v846_v28 }
 0x4d2   : > { %2109 = vpow2.f32 %v844_v29 }
 0x4d6   : > { %v2106_v39 = vpop.eup %2105 }
 0x4d7   : > { %v648_v42 = vsel %vm635_vm2, %v2106_v39, 0.0 }
 0x4de   : > { %v2108_v41 = vpop.eup %2107 }
 0x4df   : > { %v2110_v43 = vpop.eup %2109  ;;  %v851_v44 = vsel %vm635_vm2, %v2108_v41, 0.0 }
 0x4e0   : > { %v848_v45 = vsel %vm635_vm2, %v2110_v43, 0.0 }
 0x55d   : > { %v2435_v30 = vpop.f32.mrf.mxu1 }
 0x55f   : > { %v2437_v31 = vpop.f32.mrf.mxu1 }
 0x565   : > { %v1972_v32 = vpop.f32.mrf.mxu1 }
 0x566   : > { %v1239_v33 = vsel %vm635_vm2, %v1972_v32, -inf }
 0x567   : > { %1240 = vmax.xlane.f32.xlu1 %v1239_v33  ;;  %v1227_v37 = vpop.f32.mrf.mxu1 }
 0x568   : > { %v1236_v38 = vsel %vm635_vm2, %v1227_v37, -inf }
 0x569   : > { %1237 = vmax.xlane.f32.xlu0 %v1236_v38 }
 0x56b   : > { %652 = vadd.xlane.f32.xlu1 %v651_v40  ;;  %v1829_v40 = vld [vmem:[%s2631_s5] ss:$0 sm:$0xff] }
 0x56d   : > { %649 = vadd.xlane.f32.xlu0 %v648_v42 }
 0x56f   : > { %852 = vadd.xlane.f32.xlu1 %v851_v44 }
 0x571   : > { %849 = vadd.xlane.f32.xlu0 %v848_v45 }
 0x580   : > { %658 = vrot.lane.b32.xlu1 %v2366_v35, %s2205_s28 }
 0x584   : > { %860 = vrot.lane.b32.xlu1 %v2363_v34, %s2206_s29 }
 0x587   : > { %660 = vrot.lane.b32.xlu0 %v2363_v34, %s2205_s28 }
 0x588   : > { %858 = vrot.lane.b32.xlu1 %v2366_v35, %s2206_s29  ;;  %s406_s29 = scalar_lea.vmem [#allocation2], %s1798_s20 }
 0x5f0   : > { %v1241_v46 = vpop.xlane.xlu1 %1240 }
 0x5f1   : > { %v1243_v47 = vsub.f32 %v1972_v32, %v1241_v46 }
 0x5f2   : > { %v1238_v48 = vpop.xlane.xlu0 %1237 }
 0x5f3   : > { %v1246_v49 = vmul.f32 1.442695, %v1243_v47  ;;  %v1242_v50 = vsub.f32 %v1227_v37, %v1238_v48 }
 0x5f4   : > { %v653_v51 = vpop.xlane.xlu1 %652 }
 0x5f5   : > { %2111 = vpow2.f32 %v1246_v49  ;;  %v1244_v52 = vmul.f32 1.442695, %v1242_v50 }
 0x5f6   : > { %2113 = vrcp.f32 %v653_v51  ;;  %v650_v53 = vpop.xlane.xlu0 %649 }
 0x5f7   : > { %2115 = vpow2.f32 %v1244_v52 }
 0x5f8   : > { %2117 = vrcp.f32 %v650_v53  ;;  %v853_v54 = vpop.xlane.xlu1 %852 }
 0x5f9   : > { %2119 = vrcp.f32 %v853_v54 }
 0x5fa   : > { %v850_v55 = vpop.xlane.xlu0 %849 }
 0x5fb   : > { %2121 = vrcp.f32 %v850_v55 }
 0x5fc   : > { %v659_v56 = vpop.permute.xlu1 %658 }
 0x5fe   : > { %v661_v57 = vpop.permute.xlu0 %660 }
 0x5ff   : > { %1931 = vmatprep.subr.mxu0 %v661_v57 }
 0x600   : > { %1932 = vmatpush3.msra.mxu0 %v661_v57  ;;  %v861_v59 = vpop.permute.xlu1 %860  ;;  %v1517_v57 = vld [vmem:[%s2634_s8 + $0x18] sm:$0xff] }
 0x601   : > { %1933 = vmatprep.subr.mxu0 %v659_v56  ;;  %1991 = vmatprep.subr.mxu1 %v1517_v57 }
 0x602   : > { %v2112_v58 = vpop.eup %2111  ;;  %1934 = vmatpush3.msra.mxu0 %v659_v56  ;;  %1992 = vmatpush3.msra.mxu1 %v1517_v57 }
 0x603   : > { %v2114_v60 = vpop.eup %2113  ;;  %1945 = vmatprep.subr.mxu0 %v861_v59  ;;  %v1251_v61 = vsel %vm635_vm2, %v2112_v58, 0.0 }
 0x604   : > { %v2116_v62 = vpop.eup %2115  ;;  %1252 = vadd.xlane.f32.xlu1 %v1251_v61  ;;  %v657_v5 = vmul.f32 %v2114_v60, %v2104_v36  ;;  %v859_v8 = vpop.permute.xlu1 %858  ;;  %v1514_v60 = vld [vmem:[%s2634_s8] sm:$0xff]  ;;  %v1631_v61 = vld [vmem:[%s2636_s10 + $0x78] sm:$0xff] }
 0x605   : > { %v2118_v63 = vpop.eup %2117  ;;  %v1248_v2 = vsel %vm635_vm2, %v2116_v62, 0.0 }
 0x606   : > { %1249 = vadd.xlane.f32.xlu0 %v1248_v2  ;;  %v656_v3 = vmul.f32 %v2118_v63, %v2106_v39  ;;  %v2120_v4 = vpop.eup %2119  ;;  %v1629_v63 = vld [vmem:[%s2636_s10 + $0x68] sm:$0xff] }
 0x607   : > { %v857_v9 = vmul.f32 %v2120_v4, %v2108_v41 }
 0x608   : > { %v2122_v6 = vpop.eup %2121  ;;  %1935 = vmatprep.mubr.msk.f32.mxu0 %vm635_vm2, %v656_v3 }
 0x609   : > { %1936 = vmatmul.mubr.msk.f32.vlgmr.msra.gmra.mxu0 %vm635_vm2, %v657_v5  ;;  %v856_v7 = vmul.f32 %v2122_v6, %v2110_v43 }
 0x60a   : > { %1946 = vmatpush3.msra.mxu0 %v861_v59  ;;  %v1515_v59 = vld [vmem:[%s2634_s8 + $0x8] sm:$0xff] }
 0x60b   : > { %1947 = vmatprep.subr.mxu0 %v859_v8  ;;  %1949 = vmatprep.mubr.msk.f32.mxu0 %vm635_vm2, %v856_v7 }
 0x60c   : > { %1948 = vmatpush3.msra.mxu0 %v859_v8 }
 0x60d   : > { %1950 = vmatmul.mubr.msk.f32.vlgmr.msra.gmra.mxu0 %vm635_vm2, %v857_v9  ;;  %v1832_v9 = vld [vmem:[%s2632_s6] ss:$0 sm:$0xff] }
 0x615   : > { %1258 = vrot.lane.b32.xlu1 %v2366_v35, %s2207_s15 }
 0x61c   : > { %1260 = vrot.lane.b32.xlu0 %v2363_v34, %s2207_s15  ;;  %s1732_s15 = sshll.u32 %s406_s29, 4  ;;  %s2575_s15 = int_to_ptr.vmem [resolvable:$true] %s1732_s15 }
 0x61d   : > { %s2135_s20 = scalar_lea.vmem %s2575_s15, 256 }
 0x61e   : > { %p2136_p11 = scmp.ne.s32.totalorder %s2575_s15, %s2135_s20 }
 0x620   : > { %p2137_p12 = pnand %p2136_p11, %p2316_p5 }
 0x622   : > { %p2138_p13 = pneg %p2137_p12 }
 0x68d   : > { %v1253_v10 = vpop.xlane.xlu1 %1252 }
 0x68e   : > { %2123 = vrcp.f32 %v1253_v10 }
 0x68f   : > { %v1250_v11 = vpop.xlane.xlu0 %1249 }
 0x690   : > { %2125 = vrcp.f32 %v1250_v11  ;;  %v1833_v11 = vld [vmem:[%s2633_s7] ss:$0 sm:$0xff] }
 0x691   : > { %v1259_v13 = vpop.permute.xlu1 %1258 }
 0x693   : > { %v1261_v12 = vpop.permute.xlu0 %1260 }
 0x694   : > { %1973 = vmatprep.subr.mxu0 %v1261_v12 }
 0x695   : > { %1974 = vmatpush3.msra.mxu0 %v1261_v12 }
 0x696   : > { %1975 = vmatprep.subr.mxu0 %v1259_v13 }
 0x697   : > { %1976 = vmatpush3.msra.mxu0 %v1259_v13 }
 0x698   : > { %1980 = vmatprep.subr.mxu0 %v1379_v20 }
 0x69b   : > { %v2124_v14 = vpop.eup %2123 }
 0x69c   : > { %v1257_v17 = vmul.f32 %v2124_v14, %v2112_v58  ;;  %v1516_v58 = vld [vmem:[%s2634_s8 + $0x10] sm:$0xff] }
 0x69d   : > { %v2126_v15 = vpop.eup %2125  ;;  %1993 = vmatprep.subr.mxu1 %v1516_v58 }
 0x69e   : > { %v1256_v16 = vmul.f32 %v2126_v15, %v2116_v62  ;;  %1994 = vmatpush3.msra.mxu1 %v1516_v58  ;;  %v1630_v62 = vld [vmem:[%s2636_s10 + $0x70] sm:$0xff] }
 0x69f   : > { %1995 = vmatprep.subr.mxu1 %v1515_v59 }
 0x6a0   : > { %1977 = vmatprep.mubr.msk.f32.mxu0 %vm635_vm2, %v1256_v16  ;;  %1996 = vmatpush3.msra.mxu1 %v1515_v59 }
 0x6a1   : > { %1978 = vmatmul.mubr.msk.f32.vlgmr.msra.gmra.mxu0 %vm635_vm2, %v1257_v17  ;;  %1997 = vmatprep.subr.mxu1 %v1514_v60 }
 0x6a2   : > { %1981 = vmatpush3.msra.mxu0 %v1379_v20  ;;  %1998 = vmatpush3.msra.mxu1 %v1514_v60  ;;  %v1624_v20 = vld [vmem:[%s2636_s10 + $0x40] sm:$0xff] }
 0x6a3   : > { %1982 = vmatprep.subr.mxu0 %v1378_v21 }
 0x6a4   : > { %1983 = vmatpush3.msra.mxu0 %v1378_v21  ;;  %v1623_v21 = vld [vmem:[%s2636_s10 + $0x38] sm:$0xff] }
 0x6a5   : > { %1984 = vmatprep.subr.mxu0 %v1377_v22 }
 0x6a6   : > { %1985 = vmatpush3.msra.mxu0 %v1377_v22  ;;  %v1622_v22 = vld [vmem:[%s2636_s10 + $0x30] sm:$0xff] }
 0x6a7   : > { %1986 = vmatprep.subr.mxu0 %v1376_v23 }
 0x6a8   : > { %1987 = vmatpush3.msra.mxu0 %v1376_v23  ;;  %v1621_v23 = vld [vmem:[%s2636_s10 + $0x28] sm:$0xff] }
 0x6a9   : > { %2002 = vmatprep.subr.mxu0 %v1631_v61 }
 0x6c9   : > { %v1937_v35 = vpop.f32.mrf.mxu0 }
 0x6cb   : > { %v736_v34 = vpop.f32.mrf.mxu0 }
 0x6cd   : > { %v1951_v18 = vpop.f32.mrf.mxu0 }
 0x6ce   : > { %1349 = vrot.lane.b32.xlu1 %v1951_v18, %s2639_s16  ;;  %v1626_v18 = vld [vmem:[%s2636_s10 + $0x50] sm:$0xff] }
 0x6cf   : > { %v936_v19 = vpop.f32.mrf.mxu0 }
 0x6d0   : > { %1347 = vrot.lane.b32.xlu0 %v936_v19, %s2639_s16  ;;  %v1625_v19 = vld [vmem:[%s2636_s10 + $0x48] sm:$0xff]  ;;  %s2211_s16 = smov [#allocation2]  }
 0x6d1   : > { %s2139_s0 = sshll.u32 %s2211_s16, 4  ;;  %s2140_s0 = int_to_ptr.vmem [resolvable:$false] %s2139_s0 }
 0x6d2   : > { %1357 = vrot.lane.b32.xlu1 %v2435_v30, %s2209_s17  ;;  %s2141_s1 = scalar_lea.vmem %s2140_s0, 512  ;;  %p2142_p0 = scmp.lt.s32.totalorder %s2575_s15, %s2140_s0 }
 0x6d3   : > { %p2143_p1 = scmp.lt.s32.totalorder %s2141_s1, %s2135_s20 }
 0x6d4   : > { %1355 = vrot.lane.b32.xlu0 %v2437_v31, %s2209_s17  ;;  %s1844_s17 = sshll.u32 %s2299_s25, 8  ;;  %s2585_s25 = scalar_lea.sflag [#allocation3], %s404_s19 }
 0x6d5   : > { %s2582_s28 = scalar_lea.hbm %s2638_s12, %s1844_s17  ;;  %p2144_p2 = por %p2143_p1, %p2142_p0 }
 0x6d7   : > { %p2145_p3 = pnand %p2144_p2, %p2138_p13 }
 0x740   : > { %v1350_v26 = vpop.permute.xlu1 %1349 }
 0x741   : > { %v1370_v32 = vsel %vm551_vm1, %v1937_v35, %v1350_v26  ;;  %v1628_v35 = vld [vmem:[%s2636_s10 + $0x60] sm:$0xff]  ;;  %v1618_v26 = vld [vmem:[%s2636_s10 + $0x10] sm:$0xff] }
 0x742   : > { %v1348_v27 = vpop.permute.xlu0 %1347 }
 0x743   : > { %v1369_v30 = vsel %vm551_vm1, %v736_v34, %v1348_v27  ;;  %v1627_v34 = vld [vmem:[%s2636_s10 + $0x58] sm:$0xff]  ;;  %v1617_v27 = vld [vmem:[%s2636_s10 + $0x8] sm:$0xff] }
 0x744   : > { %v1358_v28 = vpop.permute.xlu1 %1357 }
 0x745   : > { %v1372_v37 = vsel %vm635_vm2, %v1370_v32, %v1358_v28  ;;  %v1616_v28 = vld [vmem:[%s2636_s10] sm:$0xff] }
 0x746   : > { %v1356_v29 = vpop.permute.xlu0 %1355 }
 0x747   : > { %v1371_v33 = vsel %vm635_vm2, %v1369_v30, %v1356_v29  ;;  %v1834_v29 = vld [vmem:[%s2635_s9] ss:$0 sm:$0xff] }
 0x761   : > { %v1979_v24 = vpop.f32.mrf.mxu0 }
 0x762   : > { %1365 = vrot.lane.b32.xlu1 %v1979_v24, %s2210_s18  ;;  %v1620_v24 = vld [vmem:[%s2636_s10 + $0x20] sm:$0xff] }
 0x763   : > { %v1336_v25 = vpop.f32.mrf.mxu0 }
 0x764   : > { %1363 = vrot.lane.b32.xlu0 %v1336_v25, %s2210_s18  ;;  %v1619_v25 = vld [vmem:[%s2636_s10 + $0x18] sm:$0xff] }
 0x7d4   : > { %v1366_v31 = vpop.permute.xlu1 %1365 }
 0x7d5   : > { %v1375_v39 = vsel %vm1373_vm3, %v1372_v37, %v1366_v31 }
 0x7d6   : > { %v1364_v36 = vpop.permute.xlu0 %1363 }
 0x7d7   : > { %v1374_v38 = vsel %vm1373_vm3, %v1371_v33, %v1364_v36 }
 0x7d8   : > { %1988 = vmatprep.mubr.msk.f32.mxu0 %vm416_vm0, %v1374_v38 }
 0x7d9   : > { %1989 = vmatmul.mubr.msk.f32.vlgmr.msra.gmra.mxu0 %vm416_vm0, %v1375_v39 }
 0x7da   : > { %2003 = vmatpush3.msra.mxu0 %v1631_v61 }
 0x7db   : > { %2004 = vmatprep.subr.mxu0 %v1630_v62 }
 0x7dc   : > { %2005 = vmatpush3.msra.mxu0 %v1630_v62 }
 0x7dd   : > { %2006 = vmatprep.subr.mxu0 %v1629_v63 }
 0x7de   : > { %2007 = vmatpush3.msra.mxu0 %v1629_v63 }
 0x7df   : > { %2008 = vmatprep.subr.mxu0 %v1628_v35 }
 0x7e0   : > { %2009 = vmatpush3.msra.mxu0 %v1628_v35 }
 0x7e1   : > { %2010 = vmatprep.subr.mxu0 %v1627_v34 }
 0x7e2   : > { %2011 = vmatpush3.msra.mxu0 %v1627_v34 }
 0x7e3   : > { %2012 = vmatprep.subr.mxu0 %v1626_v18 }
 0x7e4   : > { %2013 = vmatpush3.msra.mxu0 %v1626_v18 }
 0x7e5   : > { %2014 = vmatprep.subr.mxu0 %v1625_v19 }
 0x7e6   : > { %2015 = vmatpush3.msra.mxu0 %v1625_v19 }
 0x7e7   : > { %2016 = vmatprep.subr.mxu0 %v1624_v20 }
 0x7e8   : > { %2017 = vmatpush3.msra.mxu0 %v1624_v20 }
 0x7e9   : > { %2018 = vmatprep.subr.mxu0 %v1623_v21 }
 0x7ea   : > { %2019 = vmatpush3.msra.mxu0 %v1623_v21 }
 0x7eb   : > { %2020 = vmatprep.subr.mxu0 %v1622_v22 }
 0x7ec   : > { %2021 = vmatpush3.msra.mxu0 %v1622_v22 }
 0x7ed   : > { %2022 = vmatprep.subr.mxu0 %v1621_v23 }
 0x7ee   : > { %2023 = vmatpush3.msra.mxu0 %v1621_v23 }
 0x7ef   : > { %2024 = vmatprep.subr.mxu0 %v1620_v24 }
 0x7f0   : > { %2025 = vmatpush3.msra.mxu0 %v1620_v24 }
 0x7f1   : > { %2026 = vmatprep.subr.mxu0 %v1619_v25 }
 0x7f2   : > { %2027 = vmatpush3.msra.mxu0 %v1619_v25 }
 0x7f3   : > { %2028 = vmatprep.subr.mxu0 %v1618_v26 }
 0x7f4   : > { %2029 = vmatpush3.msra.mxu0 %v1618_v26 }
 0x7f5   : > { %2030 = vmatprep.subr.mxu0 %v1617_v27 }
 0x7f6   : > { %2031 = vmatpush3.msra.mxu0 %v1617_v27 }
 0x7f7   : > { %2032 = vmatprep.subr.mxu0 %v1616_v28 }
 0x7f8   : > { %2033 = vmatpush3.msra.mxu0 %v1616_v28 }
 0x899   : > { %v1990_v41 = vpop.f32.mrf.mxu0 }
 0x89a   : > { %v1465_v42 = vadd.f32 %v1990_v41, %v1829_v40 }
 0x89b   : > { %v1459_v43 = vpop.f32.mrf.mxu0 }
 0x89c   : > { %v2485_v44 = vadd.f32 %v1465_v42, %v2333_v1  ;;  %v1460_v45 = vadd.f32 %v1829_v40, %v1459_v43 }
 0x89e   : > { %v2488_v46 = vadd.f32 %v1460_v45, %v2331_v0  ;;  %v1475_v47 = vsel %vm416_vm0, %v2485_v44, 0.0 }
 0x89f   : > { %1476 = vadd.xlane.f32.xlu1 %v1475_v47 }
 0x8a0   : > { %v1472_v48 = vsel %vm416_vm0, %v2488_v46, 0.0 }
 0x8a1   : > { %1473 = vadd.xlane.f32.xlu0 %v1472_v48  ;;  %v1837_v48 = vld [vmem:[%s2637_s11] ss:$0 sm:$0xff] }
 0x928   : > { %v1477_v49 = vpop.xlane.xlu1 %1476 }
 0x929   : > { %v1479_v50 = vmul.f32 0.03125, %v1477_v49 }
 0x92a   : > { %v1474_v51 = vpop.xlane.xlu0 %1473 }
 0x92b   : > { %v1478_v52 = vmul.f32 0.03125, %v1474_v51  ;;  %v1481_v53 = vsub.f32 %v2485_v44, %v1479_v50 }
 0x92d   : > { %v1480_v1 = vsub.f32 %v2488_v46, %v1478_v52  ;;  %v1483_v55 = vmul.f32 %v1481_v53, %v1481_v53 }
 0x92f   : > { %v1482_v54 = vmul.f32 %v1480_v1, %v1480_v1  ;;  %v1487_v56 = vsel %vm416_vm0, %v1483_v55, 0.0 }
 0x931   : > { %v1484_v0 = vsel %vm416_vm0, %v1482_v54, 0.0 }
 0x932   : > { %1485 = vadd.xlane.f32.xlu0 %v1484_v0 }
 0x936   : > { %1488 = vadd.xlane.f32.xlu0 %v1487_v56 }
 0x9bb   : > { %v1486_v2 = vpop.xlane.xlu0 %1485 }
 0x9bc   : > { %v1490_v3 = vmul.f32 0.03125, %v1486_v2 }
 0x9be   : > { %v1492_v4 = vadd.f32 1e-05, %v1490_v3 }
 0x9bf   : > { %v1489_v5 = vpop.xlane.xlu0 %1488 }
 0x9c0   : > { %2127 = vrsqrt.f32 %v1492_v4  ;;  %v1491_v6 = vmul.f32 0.03125, %v1489_v5 }
 0x9c2   : > { %v1493_v7 = vadd.f32 1e-05, %v1491_v6 }
 0x9c4   : > { %2129 = vrsqrt.f32 %v1493_v7 }
 0x9cd   : > { %v2128_v8 = vpop.eup %2127 }
 0x9ce   : > { %v1496_v10 = vmul.f32 %v2128_v8, %v1480_v1 }
 0x9d0   : > { %v1504_v12 = vmul.f32 %v1832_v9, %v1496_v10 }
 0x9d1   : > { %v2130_v13 = vpop.eup %2129 }
 0x9d2   : > { %v1497_v14 = vmul.f32 %v2130_v13, %v1481_v53  ;;  %v1512_v15 = vadd.f32 %v1833_v11, %v1504_v12 }
 0x9d4   : > { %v1505_v16 = vmul.f32 %v1832_v9, %v1497_v14  ;;  %1999 = vmatprep.mubr.msk.f32.mxu1 %vm416_vm0, %v1512_v15 }
 0x9d6   : > { %v1513_v17 = vadd.f32 %v1833_v11, %v1505_v16 }
 0x9d8   : > { %2000 = vmatmul.mubr.msk.f32.vlgmr.msra.gmra.mxu1 %vm416_vm0, %v1513_v17 }
 0xa98   : > { %v2001_v30 = vpop.f32.mrf.mxu1 }
 0xa99   : > { %v1603_v31 = vadd.f32 %v2001_v30, %v1834_v29 }
 0xa9a   : > { %v1597_v32 = vpop.f32.mrf.mxu1 }
 0xa9b   : > { %v1609_v33 = vmul.f32 0.70710677, %v1603_v31  ;;  %v1598_v36 = vadd.f32 %v1834_v29, %v1597_v32  ;;  %v1607_v43 = vmul.f32 0.5, %v1603_v31 }
 0xa9d   : > { %2131 = verf.f32 %v1609_v33  ;;  %v1608_v37 = vmul.f32 0.70710677, %v1598_v36  ;;  %v1606_v41 = vmul.f32 0.5, %v1598_v36 }
 0xa9f   : > { %2133 = verf.f32 %v1608_v37 }
 0xaaa   : > { %v2132_v38 = vpop.eup %2131 }
 0xaab   : > { %v1613_v40 = vadd.f32 1.0, %v2132_v38 }
 0xaac   : > { %v2134_v39 = vpop.eup %2133 }
 0xaad   : > { %v1612_v42 = vadd.f32 1.0, %v2134_v39  ;;  %v1615_v47 = vmul.f32 %v1613_v40, %v1607_v43 }
 0xaaf   : > { %v1614_v45 = vmul.f32 %v1612_v42, %v1606_v41 }
 0xab1   : > { %2034 = vmatprep.mubr.f32.mxu0 %v1614_v45 }
 0xab2   : > { %2035 = vmatmul.mubr.f32.vlgmr.msra.gmra.mxu0 %v1615_v47 }
 0xb72   : > { %v2036_v49 = vpop.f32.mrf.mxu0 }
 0xb73   : > { %v1711_v50 = vadd.f32 %v2036_v49, %v1837_v48 }
 0xb74   : > { %v1705_v51 = vpop.f32.mrf.mxu0 }
 0xb75   : > { %v1715_v52 = vadd.f32 %v1711_v50, %v2485_v44  ;;  %v1706_v53 = vadd.f32 %v1837_v48, %v1705_v51 }
 0xb77   : > { %1717 = vst.msk [vmem:[%s406_s29 + $0x8] sm:$0xff] %vm416_vm0, %v1715_v52  ;;  %v1714_v1 = vadd.f32 %v1706_v53, %v2488_v46 }
 0xb79   : > { %1716 = vst.msk [vmem:[%s406_s29] sm:$0xff] %vm416_vm0, %v1714_v1 }
 0xb7a   : > { %2148 = shalt.err (!%p2145_p3)
}
 0xb7b   : > { %s2149_s19 = scalar_lea.hbm %s2582_s28, 256  ;;  %s2153_s16 = scalar_lea.hbm %s2638_s12, 512 }
 0xb7c   : > { %p2150_p4 = scmp.ne.s32.totalorder %s2582_s28, %s2149_s19  ;;  %p2154_p9 = scmp.lt.s32.totalorder %s2582_s28, %s2638_s12 }
 0xb7d   : > { %p2155_p10 = scmp.lt.s32.totalorder %s2153_s16, %s2149_s19 }
 0xb7e   : > { %p2151_p7 = pnand %p2150_p4, %p2316_p5 }
 0xb7f   : > { %p2156_p11 = por %p2155_p10, %p2154_p9 }
 0xb80   : > { %p2152_p8 = pneg %p2151_p7 }
 0xb82   : > { %p2157_p12 = pnand %p2156_p11, %p2152_p8 }
 0xb84   : > { %2160 = shalt.err (!%p2157_p12)
}
 0xb85   : > { %s2212_s0 = smov 128   ;;  %s2646_s1 = smov 8  }
 0xb86   : > { %2037 = dma.vmem_to_hbm [thread:$0]  (%p2316_p5), %s2575_s15, 256, %s2582_s28, %s2585_s25, %s2212_s0, %s2212_s0, %s2646_s1  }
 0xb87 PF: > { %p2043_p13 = scmp.ge.s32.totalorder %s2195_s24, 2  ;;  %s1747_s20 = sand.u32 1, %s2183_s21  }
 0xb88   : > { %s1748_s19 = scalar_lea.sflag [#allocation3], %s1747_s20 }
 0xb89   : > { %p2040_p0 = pnand %p2043_p13, %p2320_p6 }
 0xb8b   : > { %p2041_p1 = pneg %p2040_p0 }
 0xb8d   : > { %2178 = dma.done.wait (%p2041_p1), %s1748_s19, 256  }
 0xb8e   : > { %2180 = vsyncadd (%p2041_p1), %s1748_s19, 4294967040  ;;  %p22_p2 = scmp.ge.s32.totalorder %s2303_s27, 4   ;;  %s2647_s21 = smov %s2187_s22 }
 0xb8f   : > { %s2648_s22 = smov %s2191_s23  ;;  %s2649_s23 = smov %s2314_s30 }
 0xb90   : > { %s2650_s24 = smov %s2303_s27  ;;  %24 = sbr.rel (!%p22_p2) target bundleno = 6 (0x6), region = 103 }
 0xb95   :  { %1753 = vsyncpa [#allocation3], 1 }
 0xb96   :  { %1755 = vsyncpa [#allocation3 + $0x1], 1 }

</bundles_post_ra>
